<compile_context>
chip_gen: v6e
topology: v6e:2x2x1
jax: 0.10.0
libtpu: 0.0.40
codegen_flags: <defaults>
</compile_context>

<pallas_src>
import jax
import jax.numpy as jnp
from jax import lax
from jax.experimental import pallas as pl
from jax.experimental.pallas import tpu as pltpu

INPUT_SIZE = 64
HIDDEN_SIZE = 32
OUTPUT_SIZE = 4
MAX_TILE_B = 8192  # rows per grid step (multiple of 128); ~2 MiB of f32 input per tile


def _cdiv(a, b):
    return -(-a // b)


def _round_up(x, m):
    return ((x + m - 1) // m) * m


def policy_mlp_kernel(x_ref, w1_ref, b1_ref, w2_ref, b2_ref, ot_ref):
    """One batch tile. x_ref: (tb, 64); ot_ref: (4, tb) — batch on the lane axis."""
    x = x_ref[...]                                    # (tb, 64), caller dtype
    w1 = w1_ref[...].astype(x.dtype)                  # (32, 64), PyTorch (out, in) layout
    # h_t[f, b] = sum_i w1[f, i] * x[b, i]  -> (32, tb).  Contraction over the
    # feature axis of both operands (the q @ k.T MXU pattern); batch lands on lanes.
    h = lax.dot_general(w1, x,
                        dimension_numbers=(((1,), (1,)), ((), ())),
                        preferred_element_type=jnp.float32)
    h = jnp.maximum(h + b1_ref[...], 0.0)             # bias (32,1) bcast over lanes; ReLU in f32
    # y_t[o, b] = sum_f w2[o, f] * h[f, b] -> (4, tb): plain (4,32)@(32,tb) matmul.
    y = jnp.dot(w2_ref[...], h, preferred_element_type=jnp.float32)
    ot_ref[...] = (y + b2_ref[...]).astype(ot_ref.dtype)


def _pick_tile(batch, tile_cap):
    """Rows per grid step: a single whole-array tile for small B, otherwise a
    multiple of 128 (lane-dense out blocks) with >= 2 steps so the 'parallel'
    batch axis can be split across both TensorCores on v7x."""
    tile_cap = max(128, (int(tile_cap) // 128) * 128)
    if batch <= 128:
        return batch                       # block dims == full array dims, grid of 1
    n_tiles = max(2, _cdiv(batch, tile_cap))
    return min(tile_cap, _round_up(_cdiv(batch, n_tiles), 128))


def policy_network_forward(state, w1, b1, w2, b2, *, tile_b=MAX_TILE_B):
    """state: [B, 64] (f32 or bf16); w1: [32, 64]; b1: [32]; w2: [4, 32]; b2: [4]."""
    batch = state.shape[0]
    assert state.shape[1] == INPUT_SIZE

    w1 = jnp.asarray(w1)
    w2 = jnp.asarray(w2, jnp.float32)
    b1c = jnp.asarray(b1, jnp.float32).reshape(HIDDEN_SIZE, 1)
    b2c = jnp.asarray(b2, jnp.float32).reshape(OUTPUT_SIZE, 1)

    tb = _pick_tile(batch, tile_b)
    grid = (_cdiv(batch, tb),)

    flops = 2 * batch * (INPUT_SIZE * HIDDEN_SIZE + HIDDEN_SIZE * OUTPUT_SIZE)
    bytes_accessed = (state.size * state.dtype.itemsize
                      + batch * OUTPUT_SIZE * 4
                      + w1.size * w1.dtype.itemsize + w2.size * 4
                      + b1c.size * 4 + b2c.size * 4)

    out_t = pl.pallas_call(
        policy_mlp_kernel,
        out_shape=jax.ShapeDtypeStruct((OUTPUT_SIZE, batch), jnp.float32),
        grid=grid,
        in_specs=[
            pl.BlockSpec((tb, INPUT_SIZE), lambda i: (i, 0)),            # x: tiled over batch rows
            pl.BlockSpec((HIDDEN_SIZE, INPUT_SIZE), lambda i: (0, 0)),   # w1 VMEM-resident
            pl.BlockSpec((HIDDEN_SIZE, 1), lambda i: (0, 0)),            # b1 VMEM-resident
            pl.BlockSpec((OUTPUT_SIZE, HIDDEN_SIZE), lambda i: (0, 0)),  # w2 VMEM-resident
            pl.BlockSpec((OUTPUT_SIZE, 1), lambda i: (0, 0)),            # b2 VMEM-resident
        ],
        out_specs=pl.BlockSpec((OUTPUT_SIZE, tb), lambda i: (0, i)),     # lane-dense (4, tb) blocks
        compiler_params=pltpu.CompilerParams(
            dimension_semantics=("parallel",),        # independent batch tiles -> megacore on v7x
            vmem_limit_bytes=32 * 1024 * 1024),
        cost_estimate=pl.CostEstimate(
            flops=flops, transcendentals=0, bytes_accessed=bytes_accessed),
    )(state, w1, b1c, w2, b2c)

    # Tiny (4, B) -> (B, 4) transpose restores the PyTorch output layout
    # (16 B/row vs the 256 B/row input read — negligible).
    return out_t.T


def init_params(key):
    # PyTorch nn.Linear-style layout and init: weight (out, in), bias (out,),
    # U(-1/sqrt(fan_in), 1/sqrt(fan_in)).
    k1, k2, k3, k4 = jax.random.split(key, 4)
    bound1 = 1.0 / (INPUT_SIZE ** 0.5)
    bound2 = 1.0 / (HIDDEN_SIZE ** 0.5)
    w1 = jax.random.uniform(k1, (HIDDEN_SIZE, INPUT_SIZE), jnp.float32, -bound1, bound1)
    b1 = jax.random.uniform(k2, (HIDDEN_SIZE,), jnp.float32, -bound1, bound1)
    w2 = jax.random.uniform(k3, (OUTPUT_SIZE, HIDDEN_SIZE), jnp.float32, -bound2, bound2)
    b2 = jax.random.uniform(k4, (OUTPUT_SIZE,), jnp.float32, -bound2, bound2)
    return w1, b1, w2, b2


def reference_forward(state, w1, b1, w2, b2):
    h = jnp.maximum(state @ w1.T + b1, 0.0)
    return h @ w2.T + b2


if __name__ == "__main__":
    # TODO(synk): PolicyNetwork.update() in the spec is an empty stub — nothing to lower.
    key = jax.random.PRNGKey(0)
    k_params, k_a, k_b, k_c = jax.random.split(key, 4)
    w1, b1, w2, b2 = init_params(k_params)
    TOL = 2e-2  # MXU matmul pass count may differ slightly from the XLA reference dot

    # 1) Small single-tile batch, not a multiple of 8 (block == full array dims).
    s1 = jax.random.normal(k_a, (12, INPUT_SIZE), jnp.float32)
    o1 = jax.block_until_ready(policy_network_forward(s1, w1, b1, w2, b2))
    r1 = reference_forward(s1, w1, b1, w2, b2)
    assert o1.shape == (12, OUTPUT_SIZE)
    assert jnp.allclose(o1, r1, atol=TOL, rtol=TOL), "mismatch vs reference (B=12)"

    # 2) Multi-tile, evenly divisible: grid of 2 tiles of 128 rows each.
    s2 = jax.random.normal(k_b, (256, INPUT_SIZE), jnp.float32)
    o2 = jax.block_until_ready(policy_network_forward(s2, w1, b1, w2, b2))
    r2 = reference_forward(s2, w1, b1, w2, b2)
    assert o2.shape == (256, OUTPUT_SIZE)
    assert jnp.allclose(o2, r2, atol=TOL, rtol=TOL), "mismatch vs reference (B=256)"

    # 3) Multi-tile with a ragged last tile (grid=2: 256 + 44 rows) — exercises
    #    Pallas' masked boundary blocks, which is what lets us skip jnp.pad entirely.
    s3 = jax.random.normal(k_c, (300, INPUT_SIZE), jnp.float32)
    o3 = jax.block_until_ready(policy_network_forward(s3, w1, b1, w2, b2))
    r3 = reference_forward(s3, w1, b1, w2, b2)
    assert o3.shape == (300, OUTPUT_SIZE)
    assert jnp.allclose(o3, r3, atol=TOL, rtol=TOL), "mismatch vs reference (B=300)"

    print("KERNEL_OK")
</pallas_src>

<mosaic_0001>
module attributes {stable_mosaic.version = 11 : i64} {
  func.func @policy_mlp_kernel(%arg0: i32, %arg1: memref<12x64xf32, #tpu.memory_space<vmem>>, %arg2: memref<32x64xf32, #tpu.memory_space<vmem>>, %arg3: memref<32x1xf32, #tpu.memory_space<vmem>>, %arg4: memref<4x32xf32, #tpu.memory_space<vmem>>, %arg5: memref<4x1xf32, #tpu.memory_space<vmem>>, %arg6: memref<4x12xf32, #tpu.memory_space<vmem>>) attributes {dimension_semantics = [#tpu.dimension_semantics<parallel>], iteration_bounds = array<i64: 1>, scalar_prefetch = 0 : i64, scratch_operands = 0 : i64, tpu.core_type = #tpu.core_type<tc>, window_params = [{transform_indices = @transform_0, window_bounds = array<i64: 12, 64>}, {pipeline_mode = #tpu.pipeline_mode<synchronous>, transform_indices = @transform_1, window_bounds = array<i64: 32, 64>}, {pipeline_mode = #tpu.pipeline_mode<synchronous>, transform_indices = @transform_2, window_bounds = array<i64: 32, 1>}, {pipeline_mode = #tpu.pipeline_mode<synchronous>, transform_indices = @transform_3, window_bounds = array<i64: 4, 32>}, {pipeline_mode = #tpu.pipeline_mode<synchronous>, transform_indices = @transform_4, window_bounds = array<i64: 4, 1>}, {transform_indices = @transform_5, window_bounds = array<i64: 4, 12>}]} {
    %c0 = arith.constant 0 : index
    %c0_0 = arith.constant 0 : index
    %0 = vector.load %arg1[%c0, %c0_0] : memref<12x64xf32, #tpu.memory_space<vmem>>, vector<12x64xf32>
    %c0_1 = arith.constant 0 : index
    %c0_2 = arith.constant 0 : index
    %1 = vector.load %arg2[%c0_1, %c0_2] : memref<32x64xf32, #tpu.memory_space<vmem>>, vector<32x64xf32>
    %cst = arith.constant dense<0.000000e+00> : vector<32x12xf32>
    %2 = tpu.matmul %1, %0, %cst {dimension_numbers = #tpu.dot_dimension_numbers<[1], [1], [0], [0], [0, 0, 1, 0], [], []>} : vector<32x64xf32>, vector<12x64xf32>, vector<32x12xf32> -> vector<32x12xf32>
    %c0_3 = arith.constant 0 : index
    %c0_4 = arith.constant 0 : index
    %3 = vector.load %arg3[%c0_3, %c0_4] : memref<32x1xf32, #tpu.memory_space<vmem>>, vector<32x1xf32>
    %4 = vector.broadcast %3 : vector<32x1xf32> to vector<32x12xf32>
    %5 = arith.addf %2, %4 : vector<32x12xf32>
    %cst_5 = arith.constant 0.000000e+00 : f32
    %6 = vector.broadcast %cst_5 : f32 to vector<32x12xf32>
    %7 = arith.maximumf %5, %6 : vector<32x12xf32>
    %c0_6 = arith.constant 0 : index
    %c0_7 = arith.constant 0 : index
    %8 = vector.load %arg4[%c0_6, %c0_7] : memref<4x32xf32, #tpu.memory_space<vmem>>, vector<4x32xf32>
    %cst_8 = arith.constant dense<0.000000e+00> : vector<4x12xf32>
    %9 = tpu.matmul %8, %7, %cst_8 {dimension_numbers = #tpu.dot_dimension_numbers<[1], [0], [0], [1], [0, 0, 1, 1], [], []>} : vector<4x32xf32>, vector<32x12xf32>, vector<4x12xf32> -> vector<4x12xf32>
    %c0_9 = arith.constant 0 : index
    %c0_10 = arith.constant 0 : index
    %10 = vector.load %arg5[%c0_9, %c0_10] : memref<4x1xf32, #tpu.memory_space<vmem>>, vector<4x1xf32>
    %11 = vector.broadcast %10 : vector<4x1xf32> to vector<4x12xf32>
    %12 = arith.addf %9, %11 : vector<4x12xf32>
    %c0_11 = arith.constant 0 : index
    %c0_12 = arith.constant 0 : index
    %13 = vector.load %arg6[%c0_11, %c0_12] : memref<4x12xf32, #tpu.memory_space<vmem>>, vector<4x12xf32>
    tpu.vector_store %arg6[%c0_11, %c0_12], %12 {strides = array<i32>} : memref<4x12xf32, #tpu.memory_space<vmem>>, vector<4x12xf32>,
    return
  }
  func.func @transform_0(%arg0: i32) -> (i32, i32) {
    %c0_i32 = arith.constant 0 : i32
    %c0_i32_0 = arith.constant 0 : i32
    return %arg0, %c0_i32 : i32, i32
  }
  func.func @transform_1(%arg0: i32) -> (i32, i32) {
    %c0_i32 = arith.constant 0 : i32
    %c0_i32_0 = arith.constant 0 : i32
    %c0_i32_1 = arith.constant 0 : i32
    return %c0_i32, %c0_i32_0 : i32, i32
  }
  func.func @transform_2(%arg0: i32) -> (i32, i32) {
    %c0_i32 = arith.constant 0 : i32
    %c0_i32_0 = arith.constant 0 : i32
    %c0_i32_1 = arith.constant 0 : i32
    return %c0_i32, %c0_i32_0 : i32, i32
  }
  func.func @transform_3(%arg0: i32) -> (i32, i32) {
    %c0_i32 = arith.constant 0 : i32
    %c0_i32_0 = arith.constant 0 : i32
    %c0_i32_1 = arith.constant 0 : i32
    return %c0_i32, %c0_i32_0 : i32, i32
  }
  func.func @transform_4(%arg0: i32) -> (i32, i32) {
    %c0_i32 = arith.constant 0 : i32
    %c0_i32_0 = arith.constant 0 : i32
    %c0_i32_1 = arith.constant 0 : i32
    return %c0_i32, %c0_i32_0 : i32, i32
  }
  func.func @transform_5(%arg0: i32) -> (i32, i32) {
    %c0_i32 = arith.constant 0 : i32
    %c0_i32_0 = arith.constant 0 : i32
    return %c0_i32, %arg0 : i32, i32
  }
}

</mosaic_0001>

<bundles_post_ra>
// kernel: tpu_custom_call.1
= control target key start
LH: loop header
LB: loop body
LE: loop exit
PB: predicated region body
PF: predicated region fallthrough
CT: control target
= control target key end

     0   :  { %10 = vsyncpa [#allocation3], 0  ;;  %s444_s0 = inlined_call_operand.hbm [shape: f32[12,64], index: 0, kind: input, shape index: {}]   ;;  %s445_s1 = inlined_call_operand.vmem [shape: f32[32,64], index: 1, kind: input, shape index: {}]   ;;  %s446_s2 = inlined_call_operand.vmem [shape: f32[32,1], index: 2, kind: input, shape index: {}]   ;;  %s447_s3 = inlined_call_operand.vmem [shape: f32[4,32], index: 3, kind: input, shape index: {}]   ;;  %s448_s4 = inlined_call_operand.vmem [shape: f32[4,1], index: 4, kind: input, shape index: {}]   ;;  %s449_s5 = inlined_call_operand.hbm [shape: f32[4,12], index: 5, kind: output, shape index: {}]  }
   0x1   :  { %11 = vsyncpa [#allocation4], 0  ;;  %s363_s18 = smov [#allocation2]  }
   0x2   :  { %s17_s19 = sshll.u32 %s363_s18, 4  ;;  %s18_s19 = int_to_ptr.vmem [resolvable:$true] %s17_s19 }
   0x3   :  { %s327_s20 = scalar_lea.vmem %s18_s19, 256  ;;  %p332_p1 = scmp.lt.s32.totalorder %s18_s19, %s18_s19 }
   0x4   :  { %p328_p0 = scmp.ne.s32.totalorder %s18_s19, %s327_s20  ;;  %p333_p2 = scmp.lt.s32.totalorder %s327_s20, %s327_s20 }
   0x6   :  { %p334_p3 = por %p333_p2, %p332_p1 }
   0x8   :  { %p335_p4 = pnand %p334_p3, %p328_p0 }
   0xa   :  { %338 = shalt.err (!%p335_p4)
}
   0xb   :  { %s364_s21 = smov 128   ;;  %s365_s22 = smov 8  }
   0xc   :  { %23 = dma.hbm_to_vmem [thread:$0]  %s444_s0, 256, %s18_s19, [#allocation3], %s364_s21, %s364_s21, %s365_s22  }
   0xd   :  { %359 = dma.done.wait [#allocation3], 256  }
   0xe   :  { %360 = vsyncadd [#allocation3], 4294967040  ;;  %v366_v0 = vmov 0   ;;  %vm65_vm0 = vcmask 523264   ;;  %v36_v1 = vld [vmem:[#allocation2 + $0x8] sm:$0xf] }
   0xf   :  { %317 = vset.pattern.permute.xlu0 %v366_v0  ;;  %318 = vset.pattern.permute.xlu1 %v366_v0  ;;  %v35_v2 = vld [vmem:[#allocation2] sm:$0xff]  ;;  %v44_v4 = vld [vmem:[%s446_s2 + $0x18] sm:$0xff]  ;;  %v42_v5 = vld [vmem:[%s446_s2 + $0x8] sm:$0xff]  ;;  %v367_v12 = vmov 0.0   ;;  %vm368_vm1 = vmmov 0   ;;  %vm180_vm2 = vcmask 261120  }
  0x10   :  { %v37_v3 = vld [vmem:[%s445_s1] sm:$0xff]  ;;  %289 = vmatprep.subr.msk.mxu0 %vm65_vm0, %v36_v1  ;;  %62 = vperm.xlu0 %317, %v44_v4   ;;  %v43_v6 = vld [vmem:[%s446_s2 + $0x10] sm:$0xff]  ;;  %v38_v8 = vld [vmem:[%s445_s1 + $0x8] sm:$0xff]  ;;  %s369_s16 = smov [#allocation5]   ;;  %vm254_vm3 = vcmask 93184  }
  0x11   :  { %293 = vmatprep.mubr.msk.f32.mxu0 %vm65_vm0, %v37_v3  ;;  %290 = vmatpush3.xpose.msk.msra.mxu0 %vm65_vm0, %v36_v1  ;;  %v41_v7 = vld [vmem:[%s446_s2] sm:$0xff]  ;;  %v39_v9 = vld [vmem:[%s445_s1 + $0x10] sm:$0xff]  ;;  %v40_v11 = vld [vmem:[%s445_s1 + $0x18] sm:$0xff]  ;;  %s262_s17 = sshll.u32 %s369_s16, 4  ;;  %s263_s17 = int_to_ptr.vmem [resolvable:$true] %s262_s17 }
  0x12   :  { %291 = vmatprep.subr.msk.mxu0 %vm65_vm0, %v35_v2  ;;  %52 = vperm.xlu1 %318, %v42_v5   ;;  %v174_v10 = vld [vmem:[%s448_s4] sm:$0xf]  ;;  %s339_s18 = scalar_lea.vmem %s263_s17, 64  ;;  %p344_p6 = scmp.lt.s32.totalorder %s263_s17, %s263_s17 }
  0x13   :  { %299 = vmatprep.subr.mxu1 %v367_v12  ;;  %307 = vmatprep.mubr.msk.f32.mxu1 %vm368_vm1, %v367_v12  ;;  %v173_v29 = vld [vmem:[%s447_s3] sm:$0xf]  ;;  %p340_p5 = scmp.ne.s32.totalorder %s263_s17, %s339_s18  ;;  %p345_p7 = scmp.lt.s32.totalorder %s339_s18, %s339_s18 }
  0x14   :  { %57 = vperm.xlu0 %317, %v43_v6  }
  0x15   :  { %292 = vmatpush3.xpose.msk.msra.mxu0 %vm65_vm0, %v35_v2  ;;  %p346_p8 = por %p345_p7, %p344_p6 }
  0x16   :  { %47 = vperm.xlu1 %318, %v41_v7  }
  0x17   :  { %p347_p9 = pnand %p346_p8, %p340_p5 }
  0x18   :  { %294 = vmatmul.mubr.msk.f32.vlgmr.msra.gmra.mxu0 %vm65_vm0, %v38_v8  ;;  %177 = vperm.xlu0 %317, %v174_v10  }
  0x19   :  { %296 = vmatprep.mubr.msk.f32.mxu0 %vm65_vm0, %v39_v9 }
  0x1c   :  { %297 = vmatmul.mubr.msk.f32.gmra.mxu0 %vm65_vm0, %v40_v11 }
  0x8b   :  { %v63_v13 = vpop.permute.xlu0 %62 }
  0x8d   :  { %v53_v14 = vpop.permute.xlu1 %52 }
  0x8f   :  { %v58_v18 = vpop.permute.xlu0 %57 }
  0x91   :  { %v48_v20 = vpop.permute.xlu1 %47 }
  0x93   :  { %v178_v30 = vpop.permute.xlu0 %177 }
  0xd8   :  { %v295_v15 = vpop.f32.mrf.mxu0 }
  0xd9   :  { %v156_v22 = vadd.f32 %v295_v15, %v53_v14 }
  0xda   :  { %v150_v16 = vpop.f32.mrf.mxu0 }
  0xdb   :  { %v151_v25 = vadd.f32 %v150_v16, %v48_v20  ;;  %v170_v27 = vmax.f32 %v156_v22, 0.0 }
  0xdc   :  { %v298_v17 = vpop.f32.mrf.mxu0 }
  0xdd   :  { %v166_v19 = vadd.f32 %v298_v17, %v63_v13  ;;  %v169_v28 = vmax.f32 %v151_v25, 0.0 }
  0xde   :  { %v160_v21 = vpop.f32.mrf.mxu0 }
  0xdf   :  { %v172_v23 = vmax.f32 %v166_v19, 0.0  ;;  %v161_v24 = vadd.f32 %v160_v21, %v58_v18 }
  0xe1   :  { %v171_v26 = vmax.f32 %v161_v24, 0.0  ;;  %300 = vmatpush3.msra.mxu1 %v172_v23 }
  0xe2   :  { %301 = vmatprep.subr.mxu1 %v367_v12 }
  0xe3   :  { %302 = vmatpush3.msra.mxu1 %v171_v26 }
  0xe4   :  { %303 = vmatprep.subr.mxu1 %v367_v12 }
  0xe5   :  { %304 = vmatpush3.msra.mxu1 %v170_v27 }
  0xe6   :  { %305 = vmatprep.subr.mxu1 %v367_v12 }
  0xe7   :  { %306 = vmatpush3.msra.mxu1 %v169_v28 }
  0xe8   :  { %308 = vmatmul.mubr.msk.f32.vlgmr.msra.gmra.mxu1 %vm180_vm2, %v173_v29 }
 0x1a8   :  { %v250_v31 = vpop.f32.mrf.mxu1 }
 0x1a9   :  { %v251_v32 = vadd.f32 %v250_v31, %v178_v30 }
 0x1aa   :  { %v309_v33 = vpop.f32.mrf.mxu1 }
 0x1ab   :  { %255 = vst.msk [vmem:[#allocation5] sm:$0xf] %vm254_vm3, %v251_v32 }
 0x1ac   :  { %350 = shalt.err (!%p347_p9)
}
 0x1ad   :  { %265 = dma.vmem_to_hbm [thread:$0]  %s263_s17, 64, %s449_s5, [#allocation4]  }
 0x1ae   :  { %361 = dma.done.wait [#allocation4], 64  }
 0x1af   :  { %362 = vsyncadd [#allocation4], 4294967232 }
 0x1b0   :  { %269 = vsyncpa [#allocation3], 1 }
 0x1b1   :  { %270 = vsyncpa [#allocation4], 1 }

</bundles_post_ra>
